<compile_context>
chip_gen: v6e
topology: v6e:2x2x1
jax: 0.10.0
libtpu: 0.0.40
codegen_flags: <defaults>
</compile_context>

<pallas_src>
import math
import jax
import jax.numpy as jnp
from jax.experimental import pallas as pl
from jax.experimental.pallas import tpu as pltpu


_VMEM_SPEC = pl.BlockSpec(memory_space=pltpu.MemorySpace.VMEM)


# ----------------------------- Pallas kernel --------------------------------

def make_siamese_kernel(sl, out_dim):
    """Build the fused siamese kernel.

    sl: dict name -> (row_start, row_stop) of each sub-matrix inside the
        packed parameter slab (all offsets are multiples of 8 so the static
        ref slices are zero-cost aligned views).
    out_dim: final output feature width (columns 0:out_dim of the padded
        working activation).
    """

    def kernel(x1a_ref, x1b_ref, x2a_ref, x2b_ref, p_ref, o1_ref, o2_ref):
        B = x1a_ref.shape[0]

        # Siamese branch fusion: weights are shared, so stack the two inputs
        # along the batch (sublane) axis inside the kernel.  Each input is a
        # full 8-sublane tile, so this is a pure aligned tile placement.
        xa = jnp.concatenate([x1a_ref[...], x2a_ref[...]], axis=0)   # (2B, 16)
        xb = jnp.concatenate([x1b_ref[...], x2b_ref[...]], axis=0)   # (2B, 24)

        # Static, tile-aligned views into the single parameter slab.
        w1a = p_ref[sl["w1a"][0]:sl["w1a"][1], :]    # (16, 64)
        w1b = p_ref[sl["w1b"][0]:sl["w1b"][1], :]    # (24, 64)
        w2 = p_ref[sl["w2"][0]:sl["w2"][1], :]       # (64, 64) block-diagonal
        pw1 = p_ref[sl["pw1"][0]:sl["pw1"][1], :]    # (64, 64) (cols 48:64 zero)
        pw2 = p_ref[sl["pw2"][0]:sl["pw2"][1], :]    # (64, 64) (rows 48:, cols 32: zero)
        bias = p_ref[sl["bias"][0]:sl["bias"][1], :]  # (8, 64) one tile, 4 bias rows
        b1 = bias[0:1, :]
        b2 = bias[1:2, :]
        pb1 = bias[2:3, :]
        pb2 = bias[3:4, :]

        # Layer 1: both modality pre-net first layers; modality outputs land
        # in disjoint column blocks (the "concat" integration is free).
        h = (jnp.dot(xa, w1a, preferred_element_type=jnp.float32)
             + jnp.dot(xb, w1b, preferred_element_type=jnp.float32)
             + b1)
        h = jnp.maximum(h, 0.0)

        # Layer 2: block-diagonal merge of the two pre-net second layers.
        h = jnp.dot(h, w2, preferred_element_type=jnp.float32) + b2
        h = jnp.maximum(h, 0.0)

        # Post-net layer 1 (acts on the already-"concatenated" activation).
        h = jnp.dot(h, pw1, preferred_element_type=jnp.float32) + pb1
        h = jnp.maximum(h, 0.0)

        # Post-net layer 2.
        h = jnp.dot(h, pw2, preferred_element_type=jnp.float32) + pb2
        h = jnp.maximum(h, 0.0)

        # Two (B, out_dim) outputs: sublane-aligned split of the stacked batch.
        o1_ref[...] = h[:B, :out_dim]
        o2_ref[...] = h[B:, :out_dim]

    return kernel


def siamese_forward(input1, input2, param_slab, slices, out_dim):
    """Siamese forward: same weights applied to both multimodal inputs.

    input1/input2 are lists of per-modality (B, feat) float32 arrays.
    Returns (output1, output2), each (B, out_dim).
    """
    B = input1[0].shape[0]
    kernel = make_siamese_kernel(slices, out_dim)
    out1, out2 = pl.pallas_call(
        kernel,
        out_shape=(jax.ShapeDtypeStruct((B, out_dim), jnp.float32),
                   jax.ShapeDtypeStruct((B, out_dim), jnp.float32)),
        in_specs=[_VMEM_SPEC] * 5,
        out_specs=(_VMEM_SPEC, _VMEM_SPEC),
    )(input1[0], input1[1], input2[0], input2[1], param_slab)
    return out1, out2


# --------------------------- parameter construction -------------------------

def xavier_uniform(key, in_dim, out_dim, gain):
    bound = gain * math.sqrt(6.0 / (in_dim + out_dim))
    return jax.random.uniform(key, (in_dim, out_dim), jnp.float32, -bound, bound)


def build_params(key, pre_net_dims, post_net_dims):
    gain = math.sqrt(2.0)  # nn.init.calculate_gain('relu')
    params = {"pre": [], "post": []}
    for dims in pre_net_dims:
        layers = []
        for i in range(len(dims) - 1):
            key, sub = jax.random.split(key)
            w = xavier_uniform(sub, dims[i], dims[i + 1], gain)
            b = jnp.zeros((1, dims[i + 1]), jnp.float32)
            layers.append((w, b))
        params["pre"].append(layers)
    for i in range(len(post_net_dims) - 1):
        key, sub = jax.random.split(key)
        w = xavier_uniform(sub, post_net_dims[i], post_net_dims[i + 1], gain)
        b = jnp.zeros((1, post_net_dims[i + 1]), jnp.float32)
        params["post"].append((w, b))
    return params


def pack_params(params):
    """Pack all weights/biases into one tile-aligned (rows, 64) f32 slab.

    Layout (row offsets all multiples of 8):
      W1a (16,64): modality-A first layer, output in cols 0:32
      W1b (24,64): modality-B first layer, output in cols 32:64
      W2  (64,64): block-diag of the two second pre-net layers
      PW1 (64,64): post layer 1 (zero-padded cols 48:64)
      PW2 (64,64): post layer 2 (zero rows 48:64, zero cols 32:64)
      bias tile (8,64): rows 0..3 = b1, b2, pb1, pb2 (zero-padded)
    Padded columns stay exactly zero through ReLU, so correctness is preserved.
    """
    (wa1, ba1), (wa2, ba2) = params["pre"][0]
    (wb1, bb1), (wb2, bb2) = params["pre"][1]
    (pw1, pb1), (pw2, pb2) = params["post"]

    H = wa2.shape[1] + wb2.shape[1]          # working width = concat width (64)
    assert H % 8 == 0
    assert wa1.shape[0] % 8 == 0 and wb1.shape[0] % 8 == 0, \
        "input dims must keep slab row offsets sublane-tile aligned"
    assert pw1.shape[0] == H and H >= pw1.shape[1] and H >= pw2.shape[1]

    def pad_block(w, rows, row_off, col_off):
        out = jnp.zeros((rows, H), jnp.float32)
        return out.at[row_off:row_off + w.shape[0],
                      col_off:col_off + w.shape[1]].set(w)

    w1a_p = pad_block(wa1, wa1.shape[0], 0, 0)                       # (16,64)
    w1b_p = pad_block(wb1, wb1.shape[0], 0, wa1.shape[1])            # (24,64)
    w2_p = pad_block(wa2, H, 0, 0)                                   # (64,64)
    w2_p = w2_p.at[wa2.shape[0]:wa2.shape[0] + wb2.shape[0],
                   wa2.shape[1]:wa2.shape[1] + wb2.shape[1]].set(wb2)
    pw1_p = pad_block(pw1, H, 0, 0)                                  # (64,64)
    pw2_p = pad_block(pw2, H, 0, 0)                                  # (64,64)

    bias_tile = jnp.zeros((8, H), jnp.float32)
    bias_tile = bias_tile.at[0, :ba1.shape[1]].set(ba1[0])
    bias_tile = bias_tile.at[0, ba1.shape[1]:ba1.shape[1] + bb1.shape[1]].set(bb1[0])
    bias_tile = bias_tile.at[1, :ba2.shape[1]].set(ba2[0])
    bias_tile = bias_tile.at[1, ba2.shape[1]:ba2.shape[1] + bb2.shape[1]].set(bb2[0])
    bias_tile = bias_tile.at[2, :pb1.shape[1]].set(pb1[0])
    bias_tile = bias_tile.at[3, :pb2.shape[1]].set(pb2[0])

    blocks = [("w1a", w1a_p), ("w1b", w1b_p), ("w2", w2_p),
              ("pw1", pw1_p), ("pw2", pw2_p), ("bias", bias_tile)]
    slices = {}
    row = 0
    for name, blk in blocks:
        slices[name] = (row, row + blk.shape[0])
        row += blk.shape[0]
        assert slices[name][0] % 8 == 0
    slab = jnp.concatenate([blk for _, blk in blocks], axis=0)       # (240, 64)
    out_dim = pw2.shape[1]
    return slab, slices, out_dim


# ------------------------------ pure-JAX reference ---------------------------

def ref_forward_once(x_list, params):
    partial = []
    for x, layers in zip(x_list, params["pre"]):
        h = x
        for (w, b) in layers:
            h = jnp.maximum(h @ w + b, 0.0)
        partial.append(h)
    h = jnp.concatenate(partial, axis=-1)
    for (w, b) in params["post"]:
        h = jnp.maximum(h @ w + b, 0.0)
    return h


# ----------------------------------- main ------------------------------------

if __name__ == "__main__":
    B = 8
    pre_net_dims = [[16, 32, 32], [24, 32, 32]]
    post_net_dims = [64, 48, 32]

    key = jax.random.PRNGKey(0)
    kp, k1, k2, k3, k4 = jax.random.split(key, 5)
    params = build_params(kp, pre_net_dims, post_net_dims)
    slab, slices, out_dim = pack_params(params)

    # input1 / input2 are each a list of per-modality feature matrices
    input1 = [jax.random.normal(k1, (B, 16), jnp.float32),
              jax.random.normal(k2, (B, 24), jnp.float32)]
    input2 = [jax.random.normal(k3, (B, 16), jnp.float32),
              jax.random.normal(k4, (B, 24), jnp.float32)]

    out1, out2 = siamese_forward(input1, input2, slab, slices, out_dim)
    out1 = jax.block_until_ready(out1)
    out2 = jax.block_until_ready(out2)

    ref1 = ref_forward_once(input1, params)
    ref2 = ref_forward_once(input2, params)
    assert out1.shape == (B, out_dim) and out2.shape == (B, out_dim)
    assert jnp.allclose(out1, ref1, atol=1e-5, rtol=1e-5)
    assert jnp.allclose(out2, ref2, atol=1e-5, rtol=1e-5)

    # TODO(synk): integration_unit is abstract in the source module; a
    # feature-axis concatenation integrator was chosen (realized here by block
    # placement of the merged weights). Training-mode dropout / batch_norm are
    # not modeled (p_dropout=0, batch_norm=False, eval semantics).
    print("KERNEL_OK")
</pallas_src>

<mosaic_0001>
module attributes {stable_mosaic.version = 11 : i64} {
  func.func @kernel(%arg0: memref<8x16xf32, #tpu.memory_space<vmem>>, %arg1: memref<8x24xf32, #tpu.memory_space<vmem>>, %arg2: memref<8x16xf32, #tpu.memory_space<vmem>>, %arg3: memref<8x24xf32, #tpu.memory_space<vmem>>, %arg4: memref<240x64xf32, #tpu.memory_space<vmem>>, %arg5: memref<8x32xf32, #tpu.memory_space<vmem>>, %arg6: memref<8x32xf32, #tpu.memory_space<vmem>>) attributes {dimension_semantics = [], scalar_prefetch = 0 : i64, scratch_operands = 0 : i64, tpu.core_type = #tpu.core_type<tc>} {
    %c0 = arith.constant 0 : index
    %c0_0 = arith.constant 0 : index
    %0 = vector.load %arg0[%c0, %c0_0] : memref<8x16xf32, #tpu.memory_space<vmem>>, vector<8x16xf32>
    %c0_1 = arith.constant 0 : index
    %c0_2 = arith.constant 0 : index
    %1 = vector.load %arg2[%c0_1, %c0_2] : memref<8x16xf32, #tpu.memory_space<vmem>>, vector<8x16xf32>
    %2 = tpu.concatenate %0, %1 in 0 : vector<8x16xf32>, vector<8x16xf32> -> vector<16x16xf32>
    %c0_3 = arith.constant 0 : index
    %c0_4 = arith.constant 0 : index
    %3 = vector.load %arg1[%c0_3, %c0_4] : memref<8x24xf32, #tpu.memory_space<vmem>>, vector<8x24xf32>
    %c0_5 = arith.constant 0 : index
    %c0_6 = arith.constant 0 : index
    %4 = vector.load %arg3[%c0_5, %c0_6] : memref<8x24xf32, #tpu.memory_space<vmem>>, vector<8x24xf32>
    %5 = tpu.concatenate %3, %4 in 0 : vector<8x24xf32>, vector<8x24xf32> -> vector<16x24xf32>
    %c0_7 = arith.constant 0 : index
    %c0_8 = arith.constant 0 : index
    %6 = vector.load %arg4[%c0_7, %c0_8] : memref<240x64xf32, #tpu.memory_space<vmem>>, vector<16x64xf32>
    %c16 = arith.constant 16 : index
    %c0_9 = arith.constant 0 : index
    %7 = vector.load %arg4[%c16, %c0_9] : memref<240x64xf32, #tpu.memory_space<vmem>>, vector<24x64xf32>
    %c40 = arith.constant 40 : index
    %c0_10 = arith.constant 0 : index
    %8 = vector.load %arg4[%c40, %c0_10] : memref<240x64xf32, #tpu.memory_space<vmem>>, vector<64x64xf32>
    %c104 = arith.constant 104 : index
    %c0_11 = arith.constant 0 : index
    %9 = vector.load %arg4[%c104, %c0_11] : memref<240x64xf32, #tpu.memory_space<vmem>>, vector<64x64xf32>
    %c168 = arith.constant 168 : index
    %c0_12 = arith.constant 0 : index
    %10 = vector.load %arg4[%c168, %c0_12] : memref<240x64xf32, #tpu.memory_space<vmem>>, vector<64x64xf32>
    %c232 = arith.constant 232 : index
    %c0_13 = arith.constant 0 : index
    %11 = vector.load %arg4[%c232, %c0_13] : memref<240x64xf32, #tpu.memory_space<vmem>>, vector<8x64xf32>
    %12 = vector.extract_strided_slice %11 {offsets = [0, 0], sizes = [1, 64], strides = [1, 1]} : vector<8x64xf32> to vector<1x64xf32>
    %13 = vector.extract_strided_slice %11 {offsets = [1, 0], sizes = [1, 64], strides = [1, 1]} : vector<8x64xf32> to vector<1x64xf32>
    %14 = vector.extract_strided_slice %11 {offsets = [2, 0], sizes = [1, 64], strides = [1, 1]} : vector<8x64xf32> to vector<1x64xf32>
    %15 = vector.extract_strided_slice %11 {offsets = [3, 0], sizes = [1, 64], strides = [1, 1]} : vector<8x64xf32> to vector<1x64xf32>
    %cst = arith.constant dense<0.000000e+00> : vector<16x64xf32>
    %16 = tpu.matmul %2, %6, %cst {dimension_numbers = #tpu.dot_dimension_numbers<[1], [0], [0], [1], [0, 0, 1, 1], [], []>} : vector<16x16xf32>, vector<16x64xf32>, vector<16x64xf32> -> vector<16x64xf32>
    %cst_14 = arith.constant dense<0.000000e+00> : vector<16x64xf32>
    %17 = tpu.matmul %5, %7, %cst_14 {dimension_numbers = #tpu.dot_dimension_numbers<[1], [0], [0], [1], [0, 0, 1, 1], [], []>} : vector<16x24xf32>, vector<24x64xf32>, vector<16x64xf32> -> vector<16x64xf32>
    %18 = arith.addf %16, %17 : vector<16x64xf32>
    %19 = vector.broadcast %12 : vector<1x64xf32> to vector<16x64xf32>
    %20 = arith.addf %18, %19 : vector<16x64xf32>
    %cst_15 = arith.constant 0.000000e+00 : f32
    %21 = vector.broadcast %cst_15 : f32 to vector<16x64xf32>
    %22 = arith.maximumf %20, %21 : vector<16x64xf32>
    %cst_16 = arith.constant dense<0.000000e+00> : vector<16x64xf32>
    %23 = tpu.matmul %22, %8, %cst_16 {dimension_numbers = #tpu.dot_dimension_numbers<[1], [0], [0], [1], [0, 0, 1, 1], [], []>} : vector<16x64xf32>, vector<64x64xf32>, vector<16x64xf32> -> vector<16x64xf32>
    %24 = vector.broadcast %13 : vector<1x64xf32> to vector<16x64xf32>
    %25 = arith.addf %23, %24 : vector<16x64xf32>
    %cst_17 = arith.constant 0.000000e+00 : f32
    %26 = vector.broadcast %cst_17 : f32 to vector<16x64xf32>
    %27 = arith.maximumf %25, %26 : vector<16x64xf32>
    %cst_18 = arith.constant dense<0.000000e+00> : vector<16x64xf32>
    %28 = tpu.matmul %27, %9, %cst_18 {dimension_numbers = #tpu.dot_dimension_numbers<[1], [0], [0], [1], [0, 0, 1, 1], [], []>} : vector<16x64xf32>, vector<64x64xf32>, vector<16x64xf32> -> vector<16x64xf32>
    %29 = vector.broadcast %14 : vector<1x64xf32> to vector<16x64xf32>
    %30 = arith.addf %28, %29 : vector<16x64xf32>
    %cst_19 = arith.constant 0.000000e+00 : f32
    %31 = vector.broadcast %cst_19 : f32 to vector<16x64xf32>
    %32 = arith.maximumf %30, %31 : vector<16x64xf32>
    %cst_20 = arith.constant dense<0.000000e+00> : vector<16x64xf32>
    %33 = tpu.matmul %32, %10, %cst_20 {dimension_numbers = #tpu.dot_dimension_numbers<[1], [0], [0], [1], [0, 0, 1, 1], [], []>} : vector<16x64xf32>, vector<64x64xf32>, vector<16x64xf32> -> vector<16x64xf32>
    %34 = vector.broadcast %15 : vector<1x64xf32> to vector<16x64xf32>
    %35 = arith.addf %33, %34 : vector<16x64xf32>
    %cst_21 = arith.constant 0.000000e+00 : f32
    %36 = vector.broadcast %cst_21 : f32 to vector<16x64xf32>
    %37 = arith.maximumf %35, %36 : vector<16x64xf32>
    %38 = vector.extract_strided_slice %37 {offsets = [0, 0], sizes = [8, 32], strides = [1, 1]} : vector<16x64xf32> to vector<8x32xf32>
    %c0_22 = arith.constant 0 : index
    %c0_23 = arith.constant 0 : index
    %39 = vector.load %arg5[%c0_22, %c0_23] : memref<8x32xf32, #tpu.memory_space<vmem>>, vector<8x32xf32>
    tpu.vector_store %arg5[%c0_22, %c0_23], %38 {strides = array<i32>} : memref<8x32xf32, #tpu.memory_space<vmem>>, vector<8x32xf32>,
    %40 = vector.extract_strided_slice %37 {offsets = [8, 0], sizes = [8, 32], strides = [1, 1]} : vector<16x64xf32> to vector<8x32xf32>
    %c0_24 = arith.constant 0 : index
    %c0_25 = arith.constant 0 : index
    %41 = vector.load %arg6[%c0_24, %c0_25] : memref<8x32xf32, #tpu.memory_space<vmem>>, vector<8x32xf32>
    tpu.vector_store %arg6[%c0_24, %c0_25], %40 {strides = array<i32>} : memref<8x32xf32, #tpu.memory_space<vmem>>, vector<8x32xf32>,
    return
  }
}

</mosaic_0001>

<bundles_post_ra>
// kernel: tpu_custom_call.1
= control target key start
LH: loop header
LB: loop body
LE: loop exit
PB: predicated region body
PF: predicated region fallthrough
CT: control target
= control target key end

     0   :  { %12 = vsyncpa [#allocation3], 0  ;;  %vm58_vm0 = vcmask 195584   ;;  %s858_s0 = inlined_call_operand.vmem [shape: f32[8,16], index: 0, kind: input, shape index: {}]   ;;  %s859_s1 = inlined_call_operand.vmem [shape: f32[8,24], index: 1, kind: input, shape index: {}]   ;;  %s860_s2 = inlined_call_operand.vmem [shape: f32[8,16], index: 2, kind: input, shape index: {}]   ;;  %s861_s3 = inlined_call_operand.vmem [shape: f32[8,24], index: 3, kind: input, shape index: {}]   ;;  %s862_s4 = inlined_call_operand.vmem [shape: f32[240,64], index: 4, kind: input, shape index: {}]   ;;  %s863_s5 = inlined_call_operand.hbm [shape: f32[8,32], index: 5, kind: output, shape index: {0}]   ;;  %s864_s6 = inlined_call_operand.hbm [shape: f32[8,32], index: 6, kind: output, shape index: {1}]  }
   0x1   :  { %v32_v0 = vld [vmem:[%s862_s4 + $0x20] sm:$0xff]  ;;  %v31_v1 = vld [vmem:[%s862_s4 + $0x18] sm:$0xff]  ;;  %v30_v3 = vld [vmem:[%s862_s4 + $0x10] sm:$0xff] }
   0x2   :  { %572 = vmatprep.subr.mxu0 %v32_v0  ;;  %v26_v2 = vld [vmem:[%s859_s1] sm:$0xff] }
   0x3   :  { %573 = vmatpush3.msra.mxu0 %v32_v0  ;;  %578 = vmatprep.mubr.msk.f32.mxu0 %vm58_vm0, %v26_v2  ;;  %v40_v4 = vld [vmem:[%s862_s4 + $0x60] sm:$0xff] }
   0x4   :  { %574 = vmatprep.subr.mxu0 %v31_v1 }
   0x5   :  { %13 = vsyncpa [#allocation5], 0  ;;  %575 = vmatpush3.msra.mxu0 %v31_v1  ;;  %v27_v5 = vld [vmem:[%s861_s3] sm:$0xff]  ;;  %v29_v6 = vld [vmem:[%s862_s4 + $0x8] sm:$0xff]  ;;  %588 = vmatprep.subr.mxu1 %v40_v4  ;;  %vm140_vm1 = vcmask 130048   ;;  %v222_v21 = vlaneseq  ;;  %vm234_vm2 = vcmask 523264  }
   0x6   :  { %576 = vmatprep.subr.mxu0 %v30_v3  ;;  %v24_v7 = vld [vmem:[%s858_s0] sm:$0xff]  ;;  %589 = vmatpush3.msra.mxu1 %v40_v4  ;;  %v39_v10 = vld [vmem:[%s862_s4 + $0x58] sm:$0xff]  ;;  %v38_v11 = vld [vmem:[%s862_s4 + $0x50] sm:$0xff]  ;;  %vm492_vm3 = vcmask 261120   ;;  %s692_s1 = smov [#allocation2]  }
   0x7   :  { %577 = vmatpush3.msra.mxu0 %v30_v3  ;;  %v28_v8 = vld [vmem:[%s862_s4] sm:$0xff]  ;;  %590 = vmatprep.subr.mxu1 %v39_v10  ;;  %v37_v12 = vld [vmem:[%s862_s4 + $0x48] sm:$0xff]  ;;  %v35_v14 = vld [vmem:[%s862_s4 + $0x38] sm:$0xff]  ;;  %v793_v22 = vshrl.u32 %v222_v21, 7  ;;  %s501_s10 = sshll.u32 %s692_s1, 4  ;;  %s502_s10 = int_to_ptr.vmem [resolvable:$true] %s501_s10 }
   0x8   :  { %579 = vmatmul.mubr.msk.f32.vlgmr.msra.gmra.mxu0 %vm58_vm0, %v27_v5  ;;  %581 = vmatprep.subr.mxu0 %v29_v6  ;;  %v25_v9 = vld [vmem:[%s860_s2] sm:$0xff]  ;;  %v34_v15 = vld [vmem:[%s862_s4 + $0x30] sm:$0xff]  ;;  %v33_v16 = vld [vmem:[%s862_s4 + $0x28] sm:$0xff] }
   0x9   :  { %582 = vmatpush3.msra.mxu0 %v29_v6  ;;  %585 = vmatprep.mubr.msk.f32.mxu0 %vm140_vm1, %v24_v7  ;;  %v36_v13 = vld [vmem:[%s862_s4 + $0x40] sm:$0xff]  ;;  %v47_v18 = vld [vmem:[%s862_s4 + $0x98] sm:$0xff]  ;;  %v46_v19 = vld [vmem:[%s862_s4 + $0x90] sm:$0xff]  ;;  %v224_v24 = vsub.s32 0, %v793_v22  ;;  %v232_v44 = vsub.s32 1, %v793_v22  ;;  %v320_v56 = vsub.s32 2, %v793_v22 }
   0xa   :  { %583 = vmatprep.subr.mxu0 %v28_v8  ;;  %591 = vmatpush3.msra.mxu1 %v39_v10  ;;  %v48_v17 = vld [vmem:[%s862_s4 + $0xa0] sm:$0xff]  ;;  %v45_v20 = vld [vmem:[%s862_s4 + $0x88] sm:$0xff]  ;;  %v43_v37 = vld [vmem:[%s862_s4 + $0x78] sm:$0xff]  ;;  %v407_v0 = vsub.s32 3, %v793_v22 }
   0xb   :  { %584 = vmatpush3.msra.mxu0 %v28_v8  ;;  %592 = vmatprep.subr.mxu1 %v38_v11  ;;  %v799_v25 = vld [vmem:[%s862_s4 + $0xe8] sm:$0xff]  ;;  %v44_v36 = vld [vmem:[%s862_s4 + $0x80] sm:$0xff]  ;;  %v42_v38 = vld [vmem:[%s862_s4 + $0x70] sm:$0xff] }
   0xc   :  { %586 = vmatmul.mubr.msk.f32.vlgmr.msra.gmra.mxu0 %vm140_vm1, %v25_v9  ;;  %593 = vmatpush3.msra.mxu1 %v38_v11  ;;  %v225_v28 = vrot.slane %v799_v25, %v224_v24  ;;  %v41_v39 = vld [vmem:[%s862_s4 + $0x68] sm:$0xff]  ;;  %v56_v40 = vld [vmem:[%s862_s4 + $0xe0] sm:$0xff]  ;;  %v55_v41 = vld [vmem:[%s862_s4 + $0xd8] sm:$0xff]  ;;  %v233_v45 = vrot.slane %v799_v25, %v232_v44  ;;  %v321_v57 = vrot.slane %v799_v25, %v320_v56 }
   0xd   :  { %594 = vmatprep.subr.mxu1 %v37_v12  ;;  %607 = vmatprep.subr.mxu0 %v48_v17  ;;  %v54_v42 = vld [vmem:[%s862_s4 + $0xd0] sm:$0xff]  ;;  %v53_v43 = vld [vmem:[%s862_s4 + $0xc8] sm:$0xff]  ;;  %v52_v52 = vld [vmem:[%s862_s4 + $0xc0] sm:$0xff]  ;;  %v408_v1 = vrot.slane %v799_v25, %v407_v0 }
   0xe   :  { %595 = vmatpush3.msra.mxu1 %v37_v12  ;;  %608 = vmatpush3.msra.mxu0 %v48_v17  ;;  %v51_v53 = vld [vmem:[%s862_s4 + $0xb8] sm:$0xff]  ;;  %v50_v54 = vld [vmem:[%s862_s4 + $0xb0] sm:$0xff]  ;;  %v49_v55 = vld [vmem:[%s862_s4 + $0xa8] sm:$0xff]  ;;  %s691_s4 = smov [#allocation4]  }
   0xf   :  { %596 = vmatprep.subr.mxu1 %v36_v13  ;;  %609 = vmatprep.subr.mxu0 %v47_v18  ;;  %s511_s9 = sshll.u32 %s691_s4, 4  ;;  %s512_s9 = int_to_ptr.vmem [resolvable:$true] %s511_s9 }
  0x10   :  { %597 = vmatpush3.msra.mxu1 %v36_v13  ;;  %610 = vmatpush3.msra.mxu0 %v47_v18  ;;  %s647_s11 = scalar_lea.vmem %s512_s9, 128  ;;  %p652_p1 = scmp.lt.s32.totalorder %s512_s9, %s512_s9 }
  0x11   :  { %598 = vmatprep.subr.mxu1 %v35_v14  ;;  %611 = vmatprep.subr.mxu0 %v46_v19  ;;  %p648_p0 = scmp.ne.s32.totalorder %s512_s9, %s647_s11  ;;  %p653_p2 = scmp.lt.s32.totalorder %s647_s11, %s647_s11 }
  0x12   :  { %599 = vmatpush3.msra.mxu1 %v35_v14  ;;  %612 = vmatpush3.msra.mxu0 %v46_v19 }
  0x13   :  { %600 = vmatprep.subr.mxu1 %v34_v15  ;;  %613 = vmatprep.subr.mxu0 %v45_v20  ;;  %p654_p3 = por %p653_p2, %p652_p1 }
  0x14   :  { %601 = vmatpush3.msra.mxu1 %v34_v15  ;;  %614 = vmatpush3.msra.mxu0 %v45_v20 }
  0x15   :  { %602 = vmatprep.subr.mxu1 %v33_v16  ;;  %615 = vmatprep.subr.mxu0 %v44_v36  ;;  %p655_p4 = pnand %p654_p3, %p648_p0 }
  0x16   :  { %603 = vmatpush3.msra.mxu1 %v33_v16  ;;  %616 = vmatpush3.msra.mxu0 %v44_v36 }
  0x17   :  { %617 = vmatprep.subr.mxu0 %v43_v37  ;;  %626 = vmatprep.subr.mxu1 %v56_v40 }
  0x18   :  { %618 = vmatpush3.msra.mxu0 %v43_v37 }
  0x19   :  { %619 = vmatprep.subr.mxu0 %v42_v38 }
  0x1a   :  { %620 = vmatpush3.msra.mxu0 %v42_v38 }
  0x1b   :  { %621 = vmatprep.subr.mxu0 %v41_v39 }
  0x1c   :  { %622 = vmatpush3.msra.mxu0 %v41_v39 }
  0xc8   :  { %v580_v23 = vpop.f32.mrf.mxu0 }
  0xca   :  { %v131_v26 = vpop.f32.mrf.mxu0 }
  0xcc   :  { %v587_v27 = vpop.f32.mrf.mxu0 }
  0xcd   :  { %v219_v29 = vadd.f32 %v587_v27, %v580_v23 }
  0xce   :  { %v213_v30 = vpop.f32.mrf.mxu0 }
  0xcf   :  { %v214_v31 = vadd.f32 %v213_v30, %v131_v26  ;;  %v227_v32 = vadd.f32 %v225_v28, %v219_v29 }
  0xd1   :  { %v226_v33 = vadd.f32 %v225_v28, %v214_v31  ;;  %v229_v35 = vmax.f32 %v227_v32, 0.0 }
  0xd3   :  { %v228_v34 = vmax.f32 %v226_v33, 0.0 }
  0xd5   :  { %604 = vmatprep.mubr.msk.f32.mxu1 %vm234_vm2, %v228_v34 }
  0xd6   :  { %605 = vmatmul.mubr.msk.f32.vlgmr.msra.gmra.mxu1 %vm234_vm2, %v229_v35 }
  0xd7   :  { %627 = vmatpush3.msra.mxu1 %v56_v40 }
  0xd8   :  { %628 = vmatprep.subr.mxu1 %v55_v41 }
  0xd9   :  { %629 = vmatpush3.msra.mxu1 %v55_v41 }
  0xda   :  { %630 = vmatprep.subr.mxu1 %v54_v42 }
  0xdb   :  { %631 = vmatpush3.msra.mxu1 %v54_v42 }
  0xdc   :  { %632 = vmatprep.subr.mxu1 %v53_v43 }
  0xdd   :  { %633 = vmatpush3.msra.mxu1 %v53_v43 }
  0xde   :  { %634 = vmatprep.subr.mxu1 %v52_v52 }
  0xdf   :  { %635 = vmatpush3.msra.mxu1 %v52_v52 }
  0xe0   :  { %636 = vmatprep.subr.mxu1 %v51_v53 }
  0xe1   :  { %637 = vmatpush3.msra.mxu1 %v51_v53 }
  0xe2   :  { %638 = vmatprep.subr.mxu1 %v50_v54 }
  0xe3   :  { %639 = vmatpush3.msra.mxu1 %v50_v54 }
  0xe4   :  { %640 = vmatprep.subr.mxu1 %v49_v55 }
  0xe5   :  { %641 = vmatpush3.msra.mxu1 %v49_v55 }
 0x196   :  { %v606_v46 = vpop.f32.mrf.mxu1 }
 0x197   :  { %v313_v47 = vadd.f32 %v606_v46, %v233_v45 }
 0x198   :  { %v307_v48 = vpop.f32.mrf.mxu1 }
 0x199   :  { %v308_v49 = vadd.f32 %v307_v48, %v233_v45  ;;  %v317_v51 = vmax.f32 %v313_v47, 0.0 }
 0x19b   :  { %v316_v50 = vmax.f32 %v308_v49, 0.0 }
 0x19d   :  { %623 = vmatprep.mubr.msk.f32.mxu0 %vm234_vm2, %v316_v50 }
 0x19e   :  { %624 = vmatmul.mubr.msk.f32.vlgmr.msra.gmra.mxu0 %vm234_vm2, %v317_v51 }
 0x25e   :  { %v625_v58 = vpop.f32.mrf.mxu0 }
 0x25f   :  { %v400_v59 = vadd.f32 %v625_v58, %v321_v57 }
 0x260   :  { %v394_v60 = vpop.f32.mrf.mxu0 }
 0x261   :  { %v395_v61 = vadd.f32 %v394_v60, %v321_v57  ;;  %v404_v63 = vmax.f32 %v400_v59, 0.0 }
 0x263   :  { %v403_v62 = vmax.f32 %v395_v61, 0.0 }
 0x265   :  { %642 = vmatprep.mubr.msk.f32.mxu1 %vm234_vm2, %v403_v62 }
 0x266   :  { %643 = vmatmul.mubr.msk.f32.vlgmr.msra.gmra.mxu1 %vm234_vm2, %v404_v63 }
 0x326   :  { %v644_v2 = vpop.f32.mrf.mxu1 }
 0x327   :  { %v487_v3 = vadd.f32 %v644_v2, %v408_v1 }
 0x328   :  { %v481_v4 = vpop.f32.mrf.mxu1 }
 0x329   :  { %v491_v5 = vmax.f32 %v487_v3, 0.0  ;;  %v482_v6 = vadd.f32 %v481_v4, %v408_v1 }
 0x32b   :  { %v490_v7 = vmax.f32 %v482_v6, 0.0  ;;  %494 = vst.msk [vmem:[#allocation4] sm:$0xff] %vm492_vm3, %v491_v5 }
 0x32c   :  { %658 = shalt.err (!%p655_p4)
}
 0x32d   :  { %514 = dma.vmem_to_hbm [thread:$0]  %s512_s9, 128, %s864_s6, [#allocation5]   ;;  %493 = vst.msk [vmem:[#allocation2] sm:$0xff] %vm492_vm3, %v490_v7 }
 0x32e   :  { %s667_s3 = scalar_lea.vmem %s502_s10, 128  ;;  %p672_p6 = scmp.lt.s32.totalorder %s502_s10, %s502_s10 }
 0x32f   :  { %p668_p5 = scmp.ne.s32.totalorder %s502_s10, %s667_s3  ;;  %p673_p7 = scmp.lt.s32.totalorder %s667_s3, %s667_s3 }
 0x331   :  { %p674_p8 = por %p673_p7, %p672_p6 }
 0x333   :  { %p675_p9 = pnand %p674_p8, %p668_p5 }
 0x335   :  { %678 = shalt.err (!%p675_p9)
}
 0x336   :  { %504 = dma.vmem_to_hbm [thread:$0]  %s502_s10, 128, %s863_s5, [#allocation3]  }
 0x337   :  { %687 = dma.done.wait [#allocation3], 128  }
 0x338   :  { %688 = vsyncadd [#allocation3], 4294967168 }
 0x339   :  { %689 = dma.done.wait [#allocation5], 128  }
 0x33a   :  { %690 = vsyncadd [#allocation5], 4294967168 }
 0x33b   :  { %521 = vsyncpa [#allocation3], 1 }
 0x33c   :  { %522 = vsyncpa [#allocation5], 1 }

</bundles_post_ra>
